<compile_context>
chip_gen: v7x
topology: tpu7x:2x2x1
jax: 0.10.0
libtpu: 0.0.40
codegen_flags: <defaults>
</compile_context>

<pallas_src>
import functools

import jax
import jax.numpy as jnp
from jax import lax
from jax.experimental import pallas as pl
from jax.experimental.pallas import tpu as pltpu

BN_EPS = 1e-5
_FALLBACK_VMEM_CAP = 64 * 1024 * 1024  # conservative (v7x-sized) fallback


def _vmem_limit_bytes():
    """Scoped-VMEM limit derived from the device, with headroom for temporaries."""
    cap = _FALLBACK_VMEM_CAP
    try:
        cap = int(pltpu.get_tpu_info().vmem_capacity_bytes)
    except Exception:
        pass  # keep the conservative fallback
    return min((cap * 5) // 8, 96 * 1024 * 1024)


def _pick_channel_block(n, c, hw, budget_bytes, min_steps=4):
    """Channels per grid step.

    The sublane block dim must be a multiple of 8 or equal to the full channel
    count.  Prefer the largest multiple of 8 that divides C, stays under
    `budget_bytes` of f32 per tile, and leaves >= `min_steps` grid steps so
    both v7x TensorCores get >= 2 pipelined steps each.
    """
    if c < 8 or c % 8 != 0:
        # Cannot split cleanly: take the whole channel dim when it is small,
        # otherwise fall back to blocks of 8 with a ragged (discarded) tail
        # block whose out-of-range channels compute throwaway values.
        return c if c < 16 else 8
    bytes_per_channel = 4 * n * hw
    cap = max(8, budget_bytes // max(bytes_per_channel, 1))
    target = min(cap, max(8, c // min_steps))
    c_blk = 8
    for cand in range(8, c + 1, 8):
        if c % cand == 0 and cand <= target:
            c_blk = cand
    return c_blk


def _frelu_kernel(x_ref, p_ref, o_ref, *, w):
    """One grid step = one block of channels, full batch + spatial extent.

    x_ref : (N, C_blk, H*W)  input; H*W rides lanes, channels ride sublanes
    p_ref : (C_blk, 16)      cols 0..8 = 3x3 taps (kh*3+kw), 9 = gamma, 10 = beta
    o_ref : (N, C_blk, H*W)
    """
    n, c_blk, hw = x_ref.shape

    # Per-channel parameters, loaded once; each (C_blk, 1) column lane-broadcasts.
    p = p_ref[...].astype(jnp.float32)                    # (C_blk, 16)
    taps = [p[:, i:i + 1] for i in range(9)]              # kh*3 + kw ordering
    gamma, beta = p[:, 9:10], p[:, 10:11]

    # Boundary masks over the flattened spatial axis (output coordinates).
    idx = lax.broadcasted_iota(jnp.int32, (1, hw), 1)
    col = idx % w
    not_left = col != 0          # taps reading column c-1 are invalid at c == 0
    not_right = col != (w - 1)   # taps reading column c+1 are invalid at c == W-1
    not_top = idx >= w           # taps reading row r-1 are invalid at r == 0
    not_bot = idx < (hw - w)     # taps reading row r+1 are invalid at r == H-1

    def conv3x3(xb):
        # Depthwise 3x3 on one (C_blk, HW) batch slice via XLU lane rotations.
        # pltpu.roll(v, s, axis)[:, j] = v[:, j - s]  (jnp.roll semantics), so
        # shift=+1 fetches the left neighbour, shift=HW-1 the right one, and
        # W / HW-W the rows above / below.  Column masks applied once here
        # commute with the whole-row rolls below (col(j +- W) == col(j)).
        xl = jnp.where(not_left, pltpu.roll(xb, shift=1, axis=1), 0.0)        # x[r, c-1]
        xr = jnp.where(not_right, pltpu.roll(xb, shift=hw - 1, axis=1), 0.0)  # x[r, c+1]
        cols = (xl, xb, xr)

        def krow(shifted, t):
            return t[0] * shifted[0] + t[1] * shifted[1] + t[2] * shifted[2]

        acc = krow(cols, taps[3:6])                                           # kh = 1
        up = tuple(pltpu.roll(v, shift=w, axis=1) for v in cols)              # kh = 0
        acc = acc + jnp.where(not_top, krow(up, taps[0:3]), 0.0)
        dn = tuple(pltpu.roll(v, shift=hw - w, axis=1) for v in cols)         # kh = 2
        acc = acc + jnp.where(not_bot, krow(dn, taps[6:9]), 0.0)
        # Conv bias intentionally omitted: the training-mode BN mean
        # subtraction cancels any per-channel constant offset exactly.
        return acc

    # Pass 1: depthwise conv per batch slice + single-pass BN statistics.
    xs, convs = [], []
    s1 = jnp.zeros((c_blk, 1), jnp.float32)
    s2 = jnp.zeros((c_blk, 1), jnp.float32)
    for b in range(n):                        # static unroll over the batch dim
        xb = x_ref[b].astype(jnp.float32)     # (C_blk, HW), HW on lanes
        cb = conv3x3(xb)
        xs.append(xb)
        convs.append(cb)
        s1 = s1 + jnp.sum(cb, axis=1, keepdims=True)
        s2 = s2 + jnp.sum(cb * cb, axis=1, keepdims=True)

    # Folded BN affine (training-mode batch stats, biased variance).
    cnt = float(n * hw)
    mean = s1 / cnt                                       # (C_blk, 1)
    var = jnp.maximum(s2 / cnt - mean * mean, 0.0)        # clamp cancellation error
    scale = gamma * lax.rsqrt(var + BN_EPS)
    shift = beta - mean * scale

    # Pass 2: normalize + funnel max; lane-dense stores (last dim = H*W).
    for b in range(n):
        o_ref[b] = jnp.maximum(xs[b], convs[b] * scale + shift).astype(o_ref.dtype)


@jax.jit
def frelu_pallas(x_nchw, conv_w, conv_b, bn_gamma, bn_beta):
    """x_nchw: (N, C, H, W).  conv_w: (C, 1, 3, 3).  Others: (C,)."""
    del conv_b  # exactly cancelled by the training-mode BN mean subtraction
    n, c, h, w = x_nchw.shape
    hw = h * w

    # Copy-free view: (N, C, H, W) -> (N, C, H*W); H*W rides the lane axis.
    x2 = x_nchw.reshape(n, c, hw)

    # All per-channel parameters in one compact operand:
    # [9 conv taps (kh*3+kw), gamma, beta, 0-pad] along the lane axis.
    params = jnp.concatenate(
        [conv_w.reshape(c, 9).astype(jnp.float32),
         bn_gamma.reshape(c, 1).astype(jnp.float32),
         bn_beta.reshape(c, 1).astype(jnp.float32),
         jnp.zeros((c, 5), jnp.float32)], axis=1)         # (C, 16)

    vmem_limit = _vmem_limit_bytes()
    # Working set per step ~= 2x(in) + 2x(out) double-buffered tiles in the
    # input dtype plus ~8 f32 compute temporaries -> per-tile budget ~ limit/12.
    # TODO(synk): for very large N*H*W even a c_blk=8 tile no longer fits VMEM;
    # that regime needs a two-pass BN (carried s1/s2 across a batch/spatial
    # grid axis, then a normalize pass) instead of this single-pass design.
    budget = max(1 << 20, vmem_limit // 12)
    c_blk = _pick_channel_block(n, c, hw, budget)
    grid = (pl.cdiv(c, c_blk),)

    kernel = functools.partial(_frelu_kernel, w=w)
    out2 = pl.pallas_call(
        kernel,
        out_shape=jax.ShapeDtypeStruct((n, c, hw), x_nchw.dtype),
        grid_spec=pltpu.PrefetchScalarGridSpec(
            num_scalar_prefetch=0,
            grid=grid,
            in_specs=[
                pl.BlockSpec((n, c_blk, hw), lambda ci: (0, ci, 0)),
                pl.BlockSpec((c_blk, 16), lambda ci: (ci, 0)),
            ],
            out_specs=pl.BlockSpec((n, c_blk, hw), lambda ci: (0, ci, 0)),
        ),
        compiler_params=pltpu.CompilerParams(
            dimension_semantics=("parallel",),
            vmem_limit_bytes=vmem_limit,
        ),
    )(x2, params)

    return out2.reshape(n, c, h, w)


def frelu_reference(x_nchw, conv_w, conv_b, bn_gamma, bn_beta):
    """Pure-JAX reference (lax conv + training-mode BN), for verification."""
    c = x_nchw.shape[1]
    x1 = lax.conv_general_dilated(
        x_nchw, conv_w, window_strides=(1, 1), padding=((1, 1), (1, 1)),
        dimension_numbers=("NCHW", "OIHW", "NCHW"), feature_group_count=c)
    x1 = x1 + conv_b[None, :, None, None]
    mean = jnp.mean(x1, axis=(0, 2, 3), keepdims=True)
    var = jnp.mean((x1 - mean) ** 2, axis=(0, 2, 3), keepdims=True)
    x1 = (x1 - mean) / jnp.sqrt(var + BN_EPS)
    x1 = x1 * bn_gamma[None, :, None, None] + bn_beta[None, :, None, None]
    return jnp.maximum(x_nchw, x1)


if __name__ == "__main__":
    key = jax.random.PRNGKey(0)
    k_x, k_w, k_b, k_g, k_be = jax.random.split(key, 5)

    N, C, H, W = 2, 4, 16, 16
    x = jax.random.normal(k_x, (N, C, H, W), jnp.float32)

    # Deterministic synthetic parameters (shapes match nn.Conv2d(C,C,3,1,1,groups=C)
    # and nn.BatchNorm2d(C)); not a checkpoint load.
    conv_w = jax.random.normal(k_w, (C, 1, 3, 3), jnp.float32) * 0.3
    conv_b = jax.random.normal(k_b, (C,), jnp.float32) * 0.1
    bn_gamma = 1.0 + 0.1 * jax.random.normal(k_g, (C,), jnp.float32)
    bn_beta = 0.1 * jax.random.normal(k_be, (C,), jnp.float32)

    out = frelu_pallas(x, conv_w, conv_b, bn_gamma, bn_beta)
    out = jax.block_until_ready(out)

    ref = frelu_reference(x, conv_w, conv_b, bn_gamma, bn_beta)
    assert out.shape == (N, C, H, W) and out.dtype == jnp.float32
    assert jnp.max(jnp.abs(out - ref)) < 2e-4, "mismatch vs reference"

    print("KERNEL_OK")
</pallas_src>

<mosaic_0001>
module attributes {stable_mosaic.version = 11 : i64} {
  func.func @_frelu_kernel(%arg0: i32, %arg1: memref<2x4x256xf32, #tpu.memory_space<vmem>>, %arg2: memref<4x16xf32, #tpu.memory_space<vmem>>, %arg3: memref<2x4x256xf32, #tpu.memory_space<vmem>>) attributes {dimension_semantics = [#tpu.dimension_semantics<parallel>], iteration_bounds = array<i64: 1>, scalar_prefetch = 0 : i64, scratch_operands = 0 : i64, tpu.core_type = #tpu.core_type<tc>, window_params = [{transform_indices = @transform_0, window_bounds = array<i64: 2, 4, 256>}, {transform_indices = @transform_1, window_bounds = array<i64: 4, 16>}, {transform_indices = @transform_2, window_bounds = array<i64: 2, 4, 256>}]} {
    %c0 = arith.constant 0 : index
    %c0_0 = arith.constant 0 : index
    %0 = vector.load %arg2[%c0, %c0_0] : memref<4x16xf32, #tpu.memory_space<vmem>>, vector<4x16xf32>
    %1 = vector.extract_strided_slice %0 {offsets = [0, 0], sizes = [4, 1], strides = [1, 1]} : vector<4x16xf32> to vector<4x1xf32>
    %2 = vector.extract_strided_slice %0 {offsets = [0, 1], sizes = [4, 1], strides = [1, 1]} : vector<4x16xf32> to vector<4x1xf32>
    %3 = vector.extract_strided_slice %0 {offsets = [0, 2], sizes = [4, 1], strides = [1, 1]} : vector<4x16xf32> to vector<4x1xf32>
    %4 = vector.extract_strided_slice %0 {offsets = [0, 3], sizes = [4, 1], strides = [1, 1]} : vector<4x16xf32> to vector<4x1xf32>
    %5 = vector.extract_strided_slice %0 {offsets = [0, 4], sizes = [4, 1], strides = [1, 1]} : vector<4x16xf32> to vector<4x1xf32>
    %6 = vector.extract_strided_slice %0 {offsets = [0, 5], sizes = [4, 1], strides = [1, 1]} : vector<4x16xf32> to vector<4x1xf32>
    %7 = vector.extract_strided_slice %0 {offsets = [0, 6], sizes = [4, 1], strides = [1, 1]} : vector<4x16xf32> to vector<4x1xf32>
    %8 = vector.extract_strided_slice %0 {offsets = [0, 7], sizes = [4, 1], strides = [1, 1]} : vector<4x16xf32> to vector<4x1xf32>
    %9 = vector.extract_strided_slice %0 {offsets = [0, 8], sizes = [4, 1], strides = [1, 1]} : vector<4x16xf32> to vector<4x1xf32>
    %10 = vector.extract_strided_slice %0 {offsets = [0, 9], sizes = [4, 1], strides = [1, 1]} : vector<4x16xf32> to vector<4x1xf32>
    %11 = vector.extract_strided_slice %0 {offsets = [0, 10], sizes = [4, 1], strides = [1, 1]} : vector<4x16xf32> to vector<4x1xf32>
    %12 = tpu.iota {dimensions = array<i32: 1>} : vector<1x256xi32>
    %c16_i32 = arith.constant 16 : i32
    %c0_i32 = arith.constant 0 : i32
    %13 = arith.cmpi eq, %c16_i32, %c0_i32 : i32
    %c1_i32 = arith.constant 1 : i32
    %14 = arith.select %13, %c1_i32, %c16_i32 : i32
    %15 = vector.broadcast %14 : i32 to vector<1x256xi32>
    %16 = arith.remsi %12, %15 : vector<1x256xi32>
    %c0_i32_1 = arith.constant 0 : i32
    %17 = vector.broadcast %c0_i32_1 : i32 to vector<1x256xi32>
    %18 = arith.cmpi ne, %16, %17 : vector<1x256xi32>
    %c0_i32_2 = arith.constant 0 : i32
    %19 = vector.broadcast %c0_i32_2 : i32 to vector<1x256xi32>
    %20 = arith.cmpi slt, %16, %19 : vector<1x256xi32>
    %c0_i32_3 = arith.constant 0 : i32
    %21 = arith.cmpi slt, %14, %c0_i32_3 : i32
    %22 = vector.broadcast %21 : i1 to vector<1x256xi1>
    %23 = vector.broadcast %22 : vector<1x256xi1> to vector<1x256xi1>
    %24 = arith.xori %20, %23 : vector<1x256xi1>
    %25 = arith.andi %24, %18 : vector<1x256xi1>
    %26 = vector.broadcast %14 : i32 to vector<1x256xi32>
    %27 = arith.addi %16, %26 : vector<1x256xi32>
    %28 = arith.select %25, %27, %16 : vector<1x256xi1>, vector<1x256xi32>
    %c0_i32_4 = arith.constant 0 : i32
    %29 = vector.broadcast %c0_i32_4 : i32 to vector<1x256xi32>
    %30 = arith.cmpi ne, %28, %29 : vector<1x256xi32>
    %c15_i32 = arith.constant 15 : i32
    %31 = vector.broadcast %c15_i32 : i32 to vector<1x256xi32>
    %32 = arith.cmpi ne, %28, %31 : vector<1x256xi32>
    %c16_i32_5 = arith.constant 16 : i32
    %33 = vector.broadcast %c16_i32_5 : i32 to vector<1x256xi32>
    %34 = arith.cmpi sge, %12, %33 : vector<1x256xi32>
    %c240_i32 = arith.constant 240 : i32
    %35 = vector.broadcast %c240_i32 : i32 to vector<1x256xi32>
    %36 = arith.cmpi slt, %12, %35 : vector<1x256xi32>
    %cst = arith.constant 0.000000e+00 : f32
    %37 = vector.broadcast %cst : f32 to vector<4x1xf32>
    %cst_6 = arith.constant 0.000000e+00 : f32
    %38 = vector.broadcast %cst_6 : f32 to vector<4x1xf32>
    %c0_7 = arith.constant 0 : index
    %c0_8 = arith.constant 0 : index
    %c0_9 = arith.constant 0 : index
    %39 = vector.load %arg1[%c0_7, %c0_8, %c0_9] : memref<2x4x256xf32, #tpu.memory_space<vmem>>, vector<1x4x256xf32>
    %40 = vector.shape_cast %39 : vector<1x4x256xf32> to vector<4x256xf32>
    %c1_i32_10 = arith.constant 1 : i32
    %41 = tpu.dynamic_rotate %40 by %c1_i32_10 dim 1 : vector<4x256xf32>, i32 -> vector<4x256xf32>
    %cst_11 = arith.constant 0.000000e+00 : f32
    %42 = vector.shape_cast %30 : vector<1x256xi1> to vector<1x256xi1>
    %43 = vector.broadcast %42 : vector<1x256xi1> to vector<4x256xi1>
    %44 = vector.broadcast %cst_11 : f32 to vector<4x256xf32>
    %45 = arith.select %43, %41, %44 : vector<4x256xi1>, vector<4x256xf32>
    %c255_i32 = arith.constant 255 : i32
    %46 = tpu.dynamic_rotate %40 by %c255_i32 dim 1 : vector<4x256xf32>, i32 -> vector<4x256xf32>
    %cst_12 = arith.constant 0.000000e+00 : f32
    %47 = vector.shape_cast %32 : vector<1x256xi1> to vector<1x256xi1>
    %48 = vector.broadcast %47 : vector<1x256xi1> to vector<4x256xi1>
    %49 = vector.broadcast %cst_12 : f32 to vector<4x256xf32>
    %50 = arith.select %48, %46, %49 : vector<4x256xi1>, vector<4x256xf32>
    %51 = vector.broadcast %4 : vector<4x1xf32> to vector<4x256xf32>
    %52 = arith.mulf %51, %45 : vector<4x256xf32>
    %53 = vector.broadcast %5 : vector<4x1xf32> to vector<4x256xf32>
    %54 = arith.mulf %53, %40 : vector<4x256xf32>
    %55 = arith.addf %52, %54 : vector<4x256xf32>
    %56 = vector.broadcast %6 : vector<4x1xf32> to vector<4x256xf32>
    %57 = arith.mulf %56, %50 : vector<4x256xf32>
    %58 = arith.addf %55, %57 : vector<4x256xf32>
    %c16_i32_13 = arith.constant 16 : i32
    %59 = tpu.dynamic_rotate %45 by %c16_i32_13 dim 1 : vector<4x256xf32>, i32 -> vector<4x256xf32>
    %c16_i32_14 = arith.constant 16 : i32
    %60 = tpu.dynamic_rotate %40 by %c16_i32_14 dim 1 : vector<4x256xf32>, i32 -> vector<4x256xf32>
    %c16_i32_15 = arith.constant 16 : i32
    %61 = tpu.dynamic_rotate %50 by %c16_i32_15 dim 1 : vector<4x256xf32>, i32 -> vector<4x256xf32>
    %62 = vector.broadcast %1 : vector<4x1xf32> to vector<4x256xf32>
    %63 = arith.mulf %62, %59 : vector<4x256xf32>
    %64 = vector.broadcast %2 : vector<4x1xf32> to vector<4x256xf32>
    %65 = arith.mulf %64, %60 : vector<4x256xf32>
    %66 = arith.addf %63, %65 : vector<4x256xf32>
    %67 = vector.broadcast %3 : vector<4x1xf32> to vector<4x256xf32>
    %68 = arith.mulf %67, %61 : vector<4x256xf32>
    %69 = arith.addf %66, %68 : vector<4x256xf32>
    %cst_16 = arith.constant 0.000000e+00 : f32
    %70 = vector.shape_cast %34 : vector<1x256xi1> to vector<1x256xi1>
    %71 = vector.broadcast %70 : vector<1x256xi1> to vector<4x256xi1>
    %72 = vector.broadcast %cst_16 : f32 to vector<4x256xf32>
    %73 = arith.select %71, %69, %72 : vector<4x256xi1>, vector<4x256xf32>
    %74 = arith.addf %58, %73 : vector<4x256xf32>
    %c240_i32_17 = arith.constant 240 : i32
    %75 = tpu.dynamic_rotate %45 by %c240_i32_17 dim 1 : vector<4x256xf32>, i32 -> vector<4x256xf32>
    %c240_i32_18 = arith.constant 240 : i32
    %76 = tpu.dynamic_rotate %40 by %c240_i32_18 dim 1 : vector<4x256xf32>, i32 -> vector<4x256xf32>
    %c240_i32_19 = arith.constant 240 : i32
    %77 = tpu.dynamic_rotate %50 by %c240_i32_19 dim 1 : vector<4x256xf32>, i32 -> vector<4x256xf32>
    %78 = vector.broadcast %7 : vector<4x1xf32> to vector<4x256xf32>
    %79 = arith.mulf %78, %75 : vector<4x256xf32>
    %80 = vector.broadcast %8 : vector<4x1xf32> to vector<4x256xf32>
    %81 = arith.mulf %80, %76 : vector<4x256xf32>
    %82 = arith.addf %79, %81 : vector<4x256xf32>
    %83 = vector.broadcast %9 : vector<4x1xf32> to vector<4x256xf32>
    %84 = arith.mulf %83, %77 : vector<4x256xf32>
    %85 = arith.addf %82, %84 : vector<4x256xf32>
    %cst_20 = arith.constant 0.000000e+00 : f32
    %86 = vector.shape_cast %36 : vector<1x256xi1> to vector<1x256xi1>
    %87 = vector.broadcast %86 : vector<1x256xi1> to vector<4x256xi1>
    %88 = vector.broadcast %cst_20 : f32 to vector<4x256xf32>
    %89 = arith.select %87, %85, %88 : vector<4x256xi1>, vector<4x256xf32>
    %90 = arith.addf %74, %89 : vector<4x256xf32>
    %cst_21 = arith.constant dense<0.000000e+00> : vector<4xf32>
    %91 = vector.multi_reduction <add>, %90, %cst_21 [1] : vector<4x256xf32> to vector<4xf32>
    %92 = vector.shape_cast %91 : vector<4xf32> to vector<4x1xf32>
    %93 = arith.addf %37, %92 : vector<4x1xf32>
    %94 = arith.mulf %90, %90 : vector<4x256xf32>
    %cst_22 = arith.constant dense<0.000000e+00> : vector<4xf32>
    %95 = vector.multi_reduction <add>, %94, %cst_22 [1] : vector<4x256xf32> to vector<4xf32>
    %96 = vector.shape_cast %95 : vector<4xf32> to vector<4x1xf32>
    %97 = arith.addf %38, %96 : vector<4x1xf32>
    %c1 = arith.constant 1 : index
    %c0_23 = arith.constant 0 : index
    %c0_24 = arith.constant 0 : index
    %98 = vector.load %arg1[%c1, %c0_23, %c0_24] : memref<2x4x256xf32, #tpu.memory_space<vmem>>, vector<1x4x256xf32>
    %99 = vector.shape_cast %98 : vector<1x4x256xf32> to vector<4x256xf32>
    %c1_i32_25 = arith.constant 1 : i32
    %100 = tpu.dynamic_rotate %99 by %c1_i32_25 dim 1 : vector<4x256xf32>, i32 -> vector<4x256xf32>
    %cst_26 = arith.constant 0.000000e+00 : f32
    %101 = vector.shape_cast %30 : vector<1x256xi1> to vector<1x256xi1>
    %102 = vector.broadcast %101 : vector<1x256xi1> to vector<4x256xi1>
    %103 = vector.broadcast %cst_26 : f32 to vector<4x256xf32>
    %104 = arith.select %102, %100, %103 : vector<4x256xi1>, vector<4x256xf32>
    %c255_i32_27 = arith.constant 255 : i32
    %105 = tpu.dynamic_rotate %99 by %c255_i32_27 dim 1 : vector<4x256xf32>, i32 -> vector<4x256xf32>
    %cst_28 = arith.constant 0.000000e+00 : f32
    %106 = vector.shape_cast %32 : vector<1x256xi1> to vector<1x256xi1>
    %107 = vector.broadcast %106 : vector<1x256xi1> to vector<4x256xi1>
    %108 = vector.broadcast %cst_28 : f32 to vector<4x256xf32>
    %109 = arith.select %107, %105, %108 : vector<4x256xi1>, vector<4x256xf32>
    %110 = vector.broadcast %4 : vector<4x1xf32> to vector<4x256xf32>
    %111 = arith.mulf %110, %104 : vector<4x256xf32>
    %112 = vector.broadcast %5 : vector<4x1xf32> to vector<4x256xf32>
    %113 = arith.mulf %112, %99 : vector<4x256xf32>
    %114 = arith.addf %111, %113 : vector<4x256xf32>
    %115 = vector.broadcast %6 : vector<4x1xf32> to vector<4x256xf32>
    %116 = arith.mulf %115, %109 : vector<4x256xf32>
    %117 = arith.addf %114, %116 : vector<4x256xf32>
    %c16_i32_29 = arith.constant 16 : i32
    %118 = tpu.dynamic_rotate %104 by %c16_i32_29 dim 1 : vector<4x256xf32>, i32 -> vector<4x256xf32>
    %c16_i32_30 = arith.constant 16 : i32
    %119 = tpu.dynamic_rotate %99 by %c16_i32_30 dim 1 : vector<4x256xf32>, i32 -> vector<4x256xf32>
    %c16_i32_31 = arith.constant 16 : i32
    %120 = tpu.dynamic_rotate %109 by %c16_i32_31 dim 1 : vector<4x256xf32>, i32 -> vector<4x256xf32>
    %121 = vector.broadcast %1 : vector<4x1xf32> to vector<4x256xf32>
    %122 = arith.mulf %121, %118 : vector<4x256xf32>
    %123 = vector.broadcast %2 : vector<4x1xf32> to vector<4x256xf32>
    %124 = arith.mulf %123, %119 : vector<4x256xf32>
    %125 = arith.addf %122, %124 : vector<4x256xf32>
    %126 = vector.broadcast %3 : vector<4x1xf32> to vector<4x256xf32>
    %127 = arith.mulf %126, %120 : vector<4x256xf32>
    %128 = arith.addf %125, %127 : vector<4x256xf32>
    %cst_32 = arith.constant 0.000000e+00 : f32
    %129 = vector.shape_cast %34 : vector<1x256xi1> to vector<1x256xi1>
    %130 = vector.broadcast %129 : vector<1x256xi1> to vector<4x256xi1>
    %131 = vector.broadcast %cst_32 : f32 to vector<4x256xf32>
    %132 = arith.select %130, %128, %131 : vector<4x256xi1>, vector<4x256xf32>
    %133 = arith.addf %117, %132 : vector<4x256xf32>
    %c240_i32_33 = arith.constant 240 : i32
    %134 = tpu.dynamic_rotate %104 by %c240_i32_33 dim 1 : vector<4x256xf32>, i32 -> vector<4x256xf32>
    %c240_i32_34 = arith.constant 240 : i32
    %135 = tpu.dynamic_rotate %99 by %c240_i32_34 dim 1 : vector<4x256xf32>, i32 -> vector<4x256xf32>
    %c240_i32_35 = arith.constant 240 : i32
    %136 = tpu.dynamic_rotate %109 by %c240_i32_35 dim 1 : vector<4x256xf32>, i32 -> vector<4x256xf32>
    %137 = vector.broadcast %7 : vector<4x1xf32> to vector<4x256xf32>
    %138 = arith.mulf %137, %134 : vector<4x256xf32>
    %139 = vector.broadcast %8 : vector<4x1xf32> to vector<4x256xf32>
    %140 = arith.mulf %139, %135 : vector<4x256xf32>
    %141 = arith.addf %138, %140 : vector<4x256xf32>
    %142 = vector.broadcast %9 : vector<4x1xf32> to vector<4x256xf32>
    %143 = arith.mulf %142, %136 : vector<4x256xf32>
    %144 = arith.addf %141, %143 : vector<4x256xf32>
    %cst_36 = arith.constant 0.000000e+00 : f32
    %145 = vector.shape_cast %36 : vector<1x256xi1> to vector<1x256xi1>
    %146 = vector.broadcast %145 : vector<1x256xi1> to vector<4x256xi1>
    %147 = vector.broadcast %cst_36 : f32 to vector<4x256xf32>
    %148 = arith.select %146, %144, %147 : vector<4x256xi1>, vector<4x256xf32>
    %149 = arith.addf %133, %148 : vector<4x256xf32>
    %cst_37 = arith.constant dense<0.000000e+00> : vector<4xf32>
    %150 = vector.multi_reduction <add>, %149, %cst_37 [1] : vector<4x256xf32> to vector<4xf32>
    %151 = vector.shape_cast %150 : vector<4xf32> to vector<4x1xf32>
    %152 = arith.addf %93, %151 : vector<4x1xf32>
    %153 = arith.mulf %149, %149 : vector<4x256xf32>
    %cst_38 = arith.constant dense<0.000000e+00> : vector<4xf32>
    %154 = vector.multi_reduction <add>, %153, %cst_38 [1] : vector<4x256xf32> to vector<4xf32>
    %155 = vector.shape_cast %154 : vector<4xf32> to vector<4x1xf32>
    %156 = arith.addf %97, %155 : vector<4x1xf32>
    %cst_39 = arith.constant 5.120000e+02 : f32
    %157 = vector.broadcast %cst_39 : f32 to vector<4x1xf32>
    %158 = arith.divf %152, %157 : vector<4x1xf32>
    %cst_40 = arith.constant 5.120000e+02 : f32
    %159 = vector.broadcast %cst_40 : f32 to vector<4x1xf32>
    %160 = arith.divf %156, %159 : vector<4x1xf32>
    %161 = arith.mulf %158, %158 : vector<4x1xf32>
    %162 = arith.subf %160, %161 : vector<4x1xf32>
    %cst_41 = arith.constant 0.000000e+00 : f32
    %163 = vector.broadcast %cst_41 : f32 to vector<4x1xf32>
    %164 = arith.maximumf %162, %163 : vector<4x1xf32>
    %cst_42 = arith.constant 9.99999974E-6 : f32
    %165 = vector.broadcast %cst_42 : f32 to vector<4x1xf32>
    %166 = arith.addf %164, %165 : vector<4x1xf32>
    %167 = math.rsqrt %166 : vector<4x1xf32>
    %168 = arith.mulf %10, %167 : vector<4x1xf32>
    %169 = arith.mulf %158, %168 : vector<4x1xf32>
    %170 = arith.subf %11, %169 : vector<4x1xf32>
    %171 = vector.broadcast %168 : vector<4x1xf32> to vector<4x256xf32>
    %172 = arith.mulf %90, %171 : vector<4x256xf32>
    %173 = vector.broadcast %170 : vector<4x1xf32> to vector<4x256xf32>
    %174 = arith.addf %172, %173 : vector<4x256xf32>
    %175 = arith.maximumf %40, %174 : vector<4x256xf32>
    %c0_43 = arith.constant 0 : index
    %c0_44 = arith.constant 0 : index
    %c0_45 = arith.constant 0 : index
    %176 = vector.load %arg3[%c0_43, %c0_44, %c0_45] : memref<2x4x256xf32, #tpu.memory_space<vmem>>, vector<1x4x256xf32>
    %177 = vector.shape_cast %176 : vector<1x4x256xf32> to vector<4x256xf32>
    %178 = vector.shape_cast %175 : vector<4x256xf32> to vector<1x4x256xf32>
    tpu.vector_store %arg3[%c0_43, %c0_44, %c0_45], %178 {strides = array<i32>} : memref<2x4x256xf32, #tpu.memory_space<vmem>>, vector<1x4x256xf32>,
    %179 = vector.broadcast %168 : vector<4x1xf32> to vector<4x256xf32>
    %180 = arith.mulf %149, %179 : vector<4x256xf32>
    %181 = vector.broadcast %170 : vector<4x1xf32> to vector<4x256xf32>
    %182 = arith.addf %180, %181 : vector<4x256xf32>
    %183 = arith.maximumf %99, %182 : vector<4x256xf32>
    %c1_46 = arith.constant 1 : index
    %c0_47 = arith.constant 0 : index
    %c0_48 = arith.constant 0 : index
    %184 = vector.load %arg3[%c1_46, %c0_47, %c0_48] : memref<2x4x256xf32, #tpu.memory_space<vmem>>, vector<1x4x256xf32>
    %185 = vector.shape_cast %184 : vector<1x4x256xf32> to vector<4x256xf32>
    %186 = vector.shape_cast %183 : vector<4x256xf32> to vector<1x4x256xf32>
    tpu.vector_store %arg3[%c1_46, %c0_47, %c0_48], %186 {strides = array<i32>} : memref<2x4x256xf32, #tpu.memory_space<vmem>>, vector<1x4x256xf32>,
    return
  }
  func.func @transform_0(%arg0: i32) -> (i32, i32, i32) {
    %c0_i32 = arith.constant 0 : i32
    %c0_i32_0 = arith.constant 0 : i32
    %c0_i32_1 = arith.constant 0 : i32
    return %c0_i32, %arg0, %c0_i32_0 : i32, i32, i32
  }
  func.func @transform_1(%arg0: i32) -> (i32, i32) {
    %c0_i32 = arith.constant 0 : i32
    %c0_i32_0 = arith.constant 0 : i32
    return %arg0, %c0_i32 : i32, i32
  }
  func.func @transform_2(%arg0: i32) -> (i32, i32, i32) {
    %c0_i32 = arith.constant 0 : i32
    %c0_i32_0 = arith.constant 0 : i32
    %c0_i32_1 = arith.constant 0 : i32
    return %c0_i32, %arg0, %c0_i32_0 : i32, i32, i32
  }
}

</mosaic_0001>

<bundles_post_ra>
// kernel: frelu_pallas.1
= control target key start
LH: loop header
LB: loop body
LE: loop exit
PB: predicated region body
PF: predicated region fallthrough
CT: control target
= control target key end

     0   :  { %v405_v2 = vmov 1   ;;  %v406_v3 = vmov 0   ;;  %s407_s13 = smov 1   ;;  %v409_v7 = vmov 3   ;;  %v410_v8 = vmov 4   ;;  %s416_s16 = smov 112   ;;  %s685_s0 = inlined_call_operand.vmem [shape: f32[2,4,256], index: 0, kind: input, shape index: {}]   ;;  %s686_s1 = inlined_call_operand.vmem [shape: f32[4,16], index: 1, kind: input, shape index: {}]   ;;  %s687_s2 = inlined_call_operand.vmem [shape: f32[2,4,256], index: 2, kind: output, shape index: {}]  }
   0x1   :  { %v438_v0 = vld [vmem:[%s685_s0 + $0x8] sm:$0xff]  ;;  %v443_v1 = vld [vmem:[%s685_s0] sm:$0xff]  ;;  %390 = vset.pattern.permute.xlu1 %v405_v2  ;;  %389 = vset.pattern.permute.xlu0 %v406_v3  ;;  %s408_s0 = smov 127   ;;  %v411_v9 = vmov 2   ;;  %v412_v10 = vmov 7   ;;  %v413_v11 = vmov 6   ;;  %v12_v14 = vlaneseq }
   0x2   :  { %218 = vrot.lane.b32.xlu1 %v438_v0, %s407_s13  ;;  %51 = vrot.lane.b32.xlu0 %v443_v1, %s407_s13  ;;  %v451_v4 = vcombine.high %v438_v0, %v438_v0  ;;  %v455_v5 = vcombine.high %v443_v1, %v443_v1  ;;  %v468_v6 = vld [vmem:[%s686_s1] sm:$0xf]  ;;  %s414_s1 = smov 16   ;;  %v415_v12 = vmov 5   ;;  %v417_v13 = vmov 8  }
   0x3   :  { %v495_v15 = vand.u32 127, %v12_v14  ;;  %vm198_vm10 = vcmask 1043456  }
   0x5   :  { %v498_v16 = vadd.s32 128, %v495_v15  ;;  %v19_v17 = vand.u32 15, %v495_v15  ;;  %vm55_vm0 = vcmp.lt.s32.totalorder %v495_v15, 1  ;;  %vm68_vm3 = vcmp.lt.s32.totalorder %v495_v15, 127 }
   0x6   :  { %220 = vrot.lane.b32.xlu1 %v451_v4, %s407_s13  ;;  %53 = vrot.lane.b32.xlu0 %v455_v5, %s407_s13  ;;  %vm104_vm6 = vcmp.lt.s32.totalorder %v495_v15, 16  ;;  %vm153_vm7 = vcmp.lt.s32.totalorder %v495_v15, 112  ;;  %vm43_vm8 = vcmp.ge.s32.totalorder %v495_v15, 16 }
   0x7   :  { %v26_v18 = vand.u32 15, %v498_v16  ;;  %vm503_vm1 = vcmp.ne.s32.totalorder %v19_v17, 0  ;;  %vm526_vm5 = vcmp.ne.s32.totalorder %v19_v17, 15  ;;  %vm46_vm9 = vcmp.lt.s32.totalorder %v498_v16, 240 }
   0x9   :  { %vm507_vm2 = vcmp.ne.s32.totalorder %v26_v18, 0  ;;  %vm522_vm4 = vcmp.ne.s32.totalorder %v26_v18, 15 }
   0xa   :  { %66 = vrot.lane.b32.xlu1 %v455_v5, %s408_s0  ;;  %64 = vrot.lane.b32.xlu0 %v443_v1, %s408_s0 }
   0xe   :  { %228 = vrot.lane.b32.xlu1 %v451_v4, %s408_s0  ;;  %226 = vrot.lane.b32.xlu0 %v438_v0, %s408_s0 }
  0x12   :  { %126 = vperm.xlu1 %390, %v468_v6   ;;  %120 = vperm.xlu0 %389, %v468_v6  }
  0x16   :  { %391 = vset.pattern.permute.xlu1 %v409_v7  ;;  %392 = vset.pattern.permute.xlu0 %v410_v8 }
  0x17   :  { %79 = vperm.xlu1 %391, %v468_v6   ;;  %85 = vperm.xlu0 %392, %v468_v6  }
  0x1b   :  { %393 = vset.pattern.permute.xlu1 %v411_v9  ;;  %395 = vset.pattern.permute.xlu0 %v412_v10 }
  0x1c   :  { %134 = vperm.xlu1 %393, %v468_v6   ;;  %175 = vperm.xlu0 %395, %v468_v6  }
  0x20   :  { %394 = vset.pattern.permute.xlu1 %v413_v11  ;;  %107 = vrot.lane.b32.xlu0 %v443_v1, %s414_s1 }
  0x21   :  { %169 = vperm.xlu1 %394, %v468_v6  }
  0x24   :  { %250 = vrot.lane.b32.xlu0 %v438_v0, %s414_s1 }
  0x25   :  { %396 = vset.pattern.permute.xlu1 %v415_v12 }
  0x26   :  { %93 = vperm.xlu1 %396, %v468_v6  }
  0x28   :  { %156 = vrot.lane.b32.xlu0 %v443_v1, %s416_s16 }
  0x2a   :  { %397 = vset.pattern.permute.xlu1 %v417_v13 }
  0x2b   :  { %183 = vperm.xlu1 %397, %v468_v6  }
  0x2c   :  { %282 = vrot.lane.b32.xlu0 %v438_v0, %s416_s16 }
  0x2f   :  { %109 = vrot.lane.b32.xlu1 %v455_v5, %s414_s1 }
  0x33   :  { %252 = vrot.lane.b32.xlu1 %v451_v4, %s414_s1 }
  0x37   :  { %158 = vrot.lane.b32.xlu1 %v455_v5, %s416_s16 }
  0x3b   :  { %284 = vrot.lane.b32.xlu1 %v451_v4, %s416_s16 }
  0x74   :  { %v219_v19 = vpop.permute.xlu1 %218  ;;  %v52_v20 = vpop.permute.xlu0 %51 }
  0x78   :  { %v221_v23 = vpop.permute.xlu1 %220  ;;  %v54_v24 = vpop.permute.xlu0 %53 }
  0x79   :  { %v56_v25 = vsel %vm55_vm0, %v52_v20, %v54_v24  ;;  %v57_v26 = vsel %vm55_vm0, %v54_v24, %v52_v20  ;;  %v222_v29 = vsel %vm55_vm0, %v219_v19, %v221_v23  ;;  %v223_v30 = vsel %vm55_vm0, %v221_v23, %v219_v19 }
  0x7a   :  { %v62_v27 = vsel %vm503_vm1, %v57_v26, 0.0  ;;  %v63_v28 = vsel %vm507_vm2, %v56_v25, 0.0  ;;  %v224_v37 = vsel %vm503_vm1, %v223_v30, 0.0  ;;  %v225_v38 = vsel %vm507_vm2, %v222_v29, 0.0 }
  0x7b   :  { %100 = vrot.lane.b32.xlu0 %v62_v27, %s414_s1  ;;  %102 = vrot.lane.b32.xlu1 %v63_v28, %s414_s1 }
  0x7c   :  { %v67_v31 = vpop.permute.xlu1 %66  ;;  %v65_v32 = vpop.permute.xlu0 %64 }
  0x7d   :  { %v69_v33 = vsel %vm68_vm3, %v65_v32, %v67_v31  ;;  %v70_v34 = vsel %vm68_vm3, %v67_v31, %v65_v32 }
  0x7e   :  { %v76_v39 = vsel %vm522_vm4, %v70_v34, 0.0  ;;  %v75_v40 = vsel %vm526_vm5, %v69_v33, 0.0 }
  0x7f   :  { %244 = vrot.lane.b32.xlu0 %v224_v37, %s414_s1  ;;  %246 = vrot.lane.b32.xlu1 %v225_v38, %s414_s1 }
  0x80   :  { %v229_v41 = vpop.permute.xlu1 %228  ;;  %v227_v42 = vpop.permute.xlu0 %226 }
  0x81   :  { %v230_v43 = vsel %vm68_vm3, %v227_v42, %v229_v41  ;;  %v231_v44 = vsel %vm68_vm3, %v229_v41, %v227_v42 }
  0x82   :  { %v233_v45 = vsel %vm522_vm4, %v231_v44, 0.0  ;;  %v232_v46 = vsel %vm526_vm5, %v230_v43, 0.0 }
  0x83   :  { %115 = vrot.lane.b32.xlu1 %v76_v39, %s414_s1  ;;  %113 = vrot.lane.b32.xlu0 %v75_v40, %s414_s1 }
  0x87   :  { %151 = vrot.lane.b32.xlu1 %v63_v28, %s416_s16  ;;  %149 = vrot.lane.b32.xlu0 %v62_v27, %s416_s16 }
  0x8b   :  { %258 = vrot.lane.b32.xlu1 %v233_v45, %s414_s1  ;;  %256 = vrot.lane.b32.xlu0 %v232_v46, %s414_s1 }
  0x8f   :  { %278 = vrot.lane.b32.xlu1 %v225_v38, %s416_s16  ;;  %276 = vrot.lane.b32.xlu0 %v224_v37, %s416_s16 }
  0x91   :  { %v556_v47 = vpop.permute.xlu1 %126  ;;  %v121_v49 = vpop.permute.xlu0 %120 }
  0x93   :  { %164 = vrot.lane.b32.xlu1 %v76_v39, %s416_s16  ;;  %162 = vrot.lane.b32.xlu0 %v75_v40, %s416_s16 }
  0x96   :  { %v80_v48 = vpop.permute.xlu1 %79  ;;  %v86_v51 = vpop.permute.xlu0 %85 }
  0x97   :  { %290 = vrot.lane.b32.xlu1 %v233_v45, %s416_s16  ;;  %288 = vrot.lane.b32.xlu0 %v232_v46, %s416_s16  ;;  %v82_v52 = vmul.f32 %v80_v48, %v62_v27  ;;  %v83_v53 = vmul.f32 %v80_v48, %v63_v28  ;;  %v234_v54 = vmul.f32 %v224_v37, %v80_v48 }
  0x98   :  { %v235_v55 = vmul.f32 %v225_v38, %v80_v48  ;;  %v88_v57 = vmul.f32 %v86_v51, %v443_v1  ;;  %v89_v58 = vmul.f32 %v86_v51, %v455_v5  ;;  %v236_v59 = vmul.f32 %v438_v0, %v86_v51 }
  0x99   :  { %v237_v60 = vmul.f32 %v451_v4, %v86_v51 }
  0x9a   :  { %v90_v61 = vadd.f32 %v88_v57, %v82_v52  ;;  %v91_v62 = vadd.f32 %v89_v58, %v83_v53  ;;  %v238_v63 = vadd.f32 %v236_v59, %v234_v54 }
  0x9b   :  { %v562_v50 = vpop.permute.xlu1 %134  ;;  %v239_v2 = vadd.f32 %v237_v60, %v235_v55  ;;  %v580_v4 = vpop.permute.xlu0 %175 }
  0x9f   :  { %v108_v18 = vpop.permute.xlu0 %107 }
  0xa0   :  { %v564_v56 = vpop.permute.xlu1 %169 }
  0xa3   :  { %v251_v20 = vpop.permute.xlu0 %250 }
  0xa5   :  { %v94_v3 = vpop.permute.xlu1 %93 }
  0xa6   :  { %v96_v7 = vmul.f32 %v94_v3, %v75_v40  ;;  %v97_v8 = vmul.f32 %v94_v3, %v76_v39  ;;  %v240_v9 = vmul.f32 %v232_v46, %v94_v3  ;;  %v241_v10 = vmul.f32 %v233_v45, %v94_v3 }
  0xa7   :  { %v157_v22 = vpop.permute.xlu0 %156 }
  0xa8   :  { %v570_v11 = vadd.f32 %v96_v7, %v90_v61  ;;  %v572_v12 = vadd.f32 %v97_v8, %v91_v62  ;;  %v574_v13 = vadd.f32 %v240_v9, %v238_v63  ;;  %v576_v5 = vadd.f32 %v241_v10, %v239_v2 }
  0xaa   :  { %v578_v14 = vpop.permute.xlu1 %183 }
  0xab   :  { %v283_v24 = vpop.permute.xlu0 %282 }
  0xae   :  { %v110_v17 = vpop.permute.xlu1 %109 }
  0xaf   :  { %v112_v38 = vsel %vm104_vm6, %v110_v17, %v108_v18  ;;  %v111_v44 = vsel %vm104_vm6, %v108_v18, %v110_v17 }
  0xb0   :  { %v129_v46 = vmul.f32 %v556_v47, %v112_v38  ;;  %v130_v63 = vmul.f32 %v556_v47, %v111_v44 }
  0xb2   :  { %v253_v19 = vpop.permute.xlu1 %252 }
  0xb3   :  { %v255_v32 = vsel %vm104_vm6, %v253_v19, %v251_v20  ;;  %v254_v39 = vsel %vm104_vm6, %v251_v20, %v253_v19 }
  0xb4   :  { %v264_v41 = vmul.f32 %v255_v32, %v556_v47  ;;  %v265_v48 = vmul.f32 %v254_v39, %v556_v47 }
  0xb6   :  { %v159_v21 = vpop.permute.xlu1 %158 }
  0xb7   :  { %v160_v2 = vsel %vm153_vm7, %v157_v22, %v159_v21  ;;  %v161_v8 = vsel %vm153_vm7, %v159_v21, %v157_v22 }
  0xb8   :  { %v178_v21 = vmul.f32 %v580_v4, %v160_v2  ;;  %v179_v22 = vmul.f32 %v580_v4, %v161_v8 }
  0xba   :  { %v285_v23 = vpop.permute.xlu1 %284 }
  0xed   :  { %v103_v25 = vpop.permute.xlu1 %102  ;;  %v101_v26 = vpop.permute.xlu0 %100 }
  0xee   :  { %v106_v34 = vsel %vm104_vm6, %v103_v25, %v101_v26  ;;  %v105_v40 = vsel %vm104_vm6, %v101_v26, %v103_v25 }
  0xef   :  { %v123_v45 = vmul.f32 %v121_v49, %v106_v34  ;;  %v124_v51 = vmul.f32 %v121_v49, %v105_v40 }
  0xf1   :  { %v247_v27 = vpop.permute.xlu1 %246  ;;  %v245_v28 = vpop.permute.xlu0 %244  ;;  %v131_v3 = vadd.f32 %v129_v46, %v123_v45  ;;  %v132_v20 = vadd.f32 %v130_v63, %v124_v51 }
  0xf2   :  { %v249_v31 = vsel %vm104_vm6, %v247_v27, %v245_v28  ;;  %v248_v33 = vsel %vm104_vm6, %v245_v28, %v247_v27 }
  0xf3   :  { %v262_v35 = vmul.f32 %v249_v31, %v121_v49  ;;  %v263_v42 = vmul.f32 %v248_v33, %v121_v49  ;;  %v287_v31 = vsel %vm153_vm7, %v285_v23, %v283_v24 }
  0xf4   :  { %v297_v46 = vmul.f32 %v287_v31, %v580_v4 }
  0xf5   :  { %v116_v29 = vpop.permute.xlu1 %115  ;;  %v114_v30 = vpop.permute.xlu0 %113  ;;  %v266_v52 = vadd.f32 %v264_v41, %v262_v35  ;;  %v267_v60 = vadd.f32 %v265_v48, %v263_v42 }
  0xf6   :  { %v118_v43 = vsel %vm104_vm6, %v116_v29, %v114_v30  ;;  %v117_v55 = vsel %vm104_vm6, %v114_v30, %v116_v29  ;;  %v286_v30 = vsel %vm153_vm7, %v283_v24, %v285_v23 }
  0xf7   :  { %v137_v57 = vmul.f32 %v562_v50, %v118_v43  ;;  %v138_v9 = vmul.f32 %v562_v50, %v117_v55  ;;  %v296_v40 = vmul.f32 %v286_v30, %v580_v4 }
  0xf9   :  { %v152_v36 = vpop.permute.xlu1 %151  ;;  %v150_v37 = vpop.permute.xlu0 %149  ;;  %v139_v47 = vadd.f32 %v137_v57, %v131_v3  ;;  %v140_v32 = vadd.f32 %v138_v9, %v132_v20 }
  0xfa   :  { %v154_v61 = vsel %vm153_vm7, %v150_v37, %v152_v36  ;;  %v155_v7 = vsel %vm153_vm7, %v152_v36, %v150_v37 }
  0xfb   :  { %v172_v25 = vmul.f32 %v564_v56, %v154_v61  ;;  %v173_v26 = vmul.f32 %v564_v56, %v155_v7  ;;  %v145_v35 = vsel %vm43_vm8, %v139_v47, 0.0  ;;  %v148_v48 = vadd.f32 %v140_v32, %v572_v12 }
  0xfc   :  { %v147_v42 = vadd.f32 %v145_v35, %v570_v11 }
  0xfd   :  { %v259_v53 = vpop.permute.xlu1 %258  ;;  %v257_v54 = vpop.permute.xlu0 %256  ;;  %v180_v38 = vadd.f32 %v178_v21, %v172_v25  ;;  %v181_v39 = vadd.f32 %v179_v22, %v173_v26  ;;  %v418_v25 = vmov 9  }
  0xfe   :  { %v260_v58 = vsel %vm104_vm6, %v257_v54, %v259_v53  ;;  %v261_v59 = vsel %vm104_vm6, %v259_v53, %v257_v54  ;;  %398 = vset.pattern.permute.xlu0 %v418_v25 }
  0xff   :  { %v268_v49 = vmul.f32 %v261_v59, %v562_v50  ;;  %v269_v62 = vmul.f32 %v260_v58, %v562_v50 }
 0x101   :  { %v270_v10 = vadd.f32 %v268_v49, %v266_v52  ;;  %v271_v17 = vadd.f32 %v269_v62, %v267_v60  ;;  %v279_v18 = vpop.permute.xlu1 %278  ;;  %v277_v19 = vpop.permute.xlu0 %276 }
 0x102   :  { %v280_v50 = vsel %vm153_vm7, %v277_v19, %v279_v18  ;;  %v281_v33 = vsel %vm153_vm7, %v279_v18, %v277_v19 }
 0x103   :  { %v272_v27 = vsel %vm43_vm8, %v270_v10, 0.0  ;;  %v275_v28 = vadd.f32 %v271_v17, %v576_v5  ;;  %v294_v36 = vmul.f32 %v280_v50, %v564_v56  ;;  %v295_v41 = vmul.f32 %v281_v33, %v564_v56 }
 0x104   :  { %v274_v29 = vadd.f32 %v272_v27, %v574_v13 }
 0x105   :  { %v165_v5 = vpop.permute.xlu1 %164  ;;  %v163_v34 = vpop.permute.xlu0 %162  ;;  %v298_v51 = vadd.f32 %v296_v40, %v294_v36  ;;  %v299_v55 = vadd.f32 %v297_v46, %v295_v41 }
 0x106   :  { %v166_v13 = vsel %vm153_vm7, %v163_v34, %v165_v5  ;;  %v167_v37 = vsel %vm153_vm7, %v165_v5, %v163_v34  ;;  %v419_v34 = vmov 10  }
 0x107   :  { %v186_v23 = vmul.f32 %v578_v14, %v166_v13  ;;  %v187_v24 = vmul.f32 %v578_v14, %v167_v37  ;;  %399 = vset.pattern.permute.xlu1 %v419_v34 }
 0x109   :  { %v188_v43 = vadd.f32 %v186_v23, %v180_v38  ;;  %v189_v44 = vadd.f32 %v187_v24, %v181_v39  ;;  %v291_v45 = vpop.permute.xlu1 %290  ;;  %v289_v52 = vpop.permute.xlu0 %288 }
 0x10a   :  { %v292_v56 = vsel %vm153_vm7, %v289_v52, %v291_v45  ;;  %v293_v11 = vsel %vm153_vm7, %v291_v45, %v289_v52 }
 0x10b   :  { %v195_v53 = vsel %vm46_vm9, %v189_v44, 0.0  ;;  %v196_v54 = vadd.f32 %v188_v43, %v147_v42  ;;  %v300_v57 = vmul.f32 %v292_v56, %v578_v14  ;;  %v301_v4 = vmul.f32 %v293_v11, %v578_v14 }
 0x10c   :  { %v197_v58 = vadd.f32 %v195_v53, %v148_v48 }
 0x10d   :  { %v199_v12 = vsel %vm198_vm10, %v196_v54, 0.0  ;;  %v205_v59 = vmul.f32 %v196_v54, %v196_v54  ;;  %v302_v60 = vadd.f32 %v300_v57, %v298_v51  ;;  %v303_v61 = vadd.f32 %v301_v4, %v299_v55 }
 0x10e   :  { %v200_v49 = vsel %vm198_vm10, %v197_v58, 0.0  ;;  %v206_v62 = vmul.f32 %v197_v58, %v197_v58 }
 0x10f   :  { %v201_v63 = vadd.f32 %v200_v49, %v199_v12  ;;  %v305_v2 = vsel %vm46_vm9, %v303_v61, 0.0  ;;  %v306_v15 = vadd.f32 %v302_v60, %v274_v29  ;;  %v207_v3 = vsel %vm198_vm10, %v205_v59, 0.0 }
 0x110   :  { %v208_v7 = vsel %vm198_vm10, %v206_v62, 0.0  ;;  %v307_v14 = vadd.f32 %v305_v2, %v275_v28 }
 0x111   :  { %202 = vadd.xlane.f32.xlu0 %v201_v63  ;;  %v308_v8 = vsel %vm198_vm10, %v306_v15, 0.0  ;;  %v314_v9 = vmul.f32 %v306_v15, %v306_v15  ;;  %v209_v10 = vadd.f32 %v208_v7, %v207_v3 }
 0x112   :  { %v309_v17 = vsel %vm198_vm10, %v307_v14, 0.0  ;;  %v315_v18 = vmul.f32 %v307_v14, %v307_v14 }
 0x113   :  { %v310_v19 = vadd.f32 %v309_v17, %v308_v8  ;;  %v316_v20 = vsel %vm198_vm10, %v314_v9, 0.0 }
 0x114   :  { %v317_v16 = vsel %vm198_vm10, %v315_v18, 0.0 }
 0x115   :  { %210 = vadd.xlane.f32.xlu0 %v209_v10  ;;  %311 = vadd.xlane.f32.xlu1 %v310_v19  ;;  %v318_v47 = vadd.f32 %v317_v16, %v316_v20 }
 0x119   :  { %319 = vadd.xlane.f32.xlu0 %v318_v47 }
 0x19e   :  { %v203_v26 = vpop.xlane.xlu0 %202 }
 0x1a2   :  { %v211_v27 = vpop.xlane.xlu0 %210  ;;  %v312_v28 = vpop.xlane.xlu1 %311 }
 0x1a3   :  { %v313_v50 = vadd.f32 %v312_v28, %v203_v26 }
 0x1a5   :  { %v323_v21 = vmul.f32 0.001953125, %v313_v50 }
 0x1a6   :  { %v320_v22 = vpop.xlane.xlu0 %319 }
 0x1a7   :  { %v321_v29 = vadd.f32 %v320_v22, %v211_v27  ;;  %v325_v30 = vmul.f32 %v323_v21, %v323_v21 }
 0x1a9   :  { %v324_v31 = vmul.f32 0.001953125, %v321_v29 }
 0x1ab   :  { %v326_v32 = vsub.f32 %v324_v31, %v325_v30 }
 0x1ad   :  { %v327_v33 = vmax.f32 %v326_v32, 0.0 }
 0x1af   :  { %v328_v5 = vadd.f32 1e-05, %v327_v33 }
 0x1b1   :  { %403 = vrsqrt.f32 %v328_v5 }
 0x1bb   :  { %v404_v35 = vpop.eup %403 }
 0x1bc   :  { %v330_v36 = vmul.f32 %v404_v35, %v468_v6 }
 0x1be   :  { %339 = vperm.xlu0 %398, %v330_v36   ;;  %v331_v13 = vmul.f32 %v330_v36, %v323_v21 }
 0x1c0   :  { %333 = vrot.lane.b32.xlu1 %v331_v13, %s407_s13 }
 0x1c2   :  { %400 = vset.pattern.permute.xlu0 %v419_v34 }
 0x232   :  { %v334_v37 = vpop.permute.xlu1 %333 }
 0x233   :  { %v336_v38 = vsub.f32 %v468_v6, %v334_v37 }
 0x235   :  { %346 = vperm.xlu1 %399, %v336_v38  }
 0x23d   :  { %v340_v39 = vpop.permute.xlu0 %339 }
 0x23e   :  { %v342_v23 = vmul.f32 %v340_v39, %v196_v54  ;;  %v343_v24 = vmul.f32 %v340_v39, %v197_v58  ;;  %v357_v40 = vmul.f32 %v340_v39, %v306_v15  ;;  %v358_v41 = vmul.f32 %v340_v39, %v307_v14 }
 0x2b4   :  { %v347_v42 = vpop.permute.xlu1 %346 }
 0x2b5   :  { %v349_v43 = vadd.f32 %v347_v42, %v342_v23  ;;  %v350_v44 = vadd.f32 %v347_v42, %v343_v24  ;;  %v359_v45 = vadd.f32 %v357_v40, %v347_v42  ;;  %v360_v46 = vadd.f32 %v358_v41, %v347_v42 }
 0x2b7   :  { %v353_v48 = vcombine.low %v349_v43, %v350_v44  ;;  %v363_v51 = vcombine.low %v359_v45, %v360_v46 }
 0x2b9   :  { %v355_v52 = vmax.f32 %v443_v1, %v353_v48  ;;  %v365_v53 = vmax.f32 %v438_v0, %v363_v51 }
 0x2bb   :  { %356 = vst [vmem:[%s687_s2] sm:$0xff] %v355_v52  ;;  %373 = vst [vmem:[%s687_s2 + $0x8] sm:$0xff] %v365_v53 }

</bundles_post_ra>
